<compile_context>
chip_gen: v7x
topology: tpu7x:2x2x1
jax: 0.10.0
libtpu: 0.0.40
codegen_flags: <defaults>
</compile_context>

<pallas_src>
import math

import jax
import jax.numpy as jnp
from jax.experimental import pallas as pl
from jax.experimental.pallas import tpu as pltpu


_LANE = 128
# Conservative per-step VMEM budget for the double-buffered pipeline
# (2 buffers * (N inputs + 1 output) * tile bytes). Fits every generation.
_VMEM_BUDGET = 24 * 1024 * 1024
_VMEM_LIMIT = 32 * 1024 * 1024          # raise v5e's 16 MiB default; safe on v7x
_TILE_TARGET_BYTES = 2 * 1024 * 1024    # ~2 MiB per input block
_MIN_SPLIT_BYTES = 512 * 1024           # below this per latent, one block is fine


def _round_up(x, m):
    return ((x + m - 1) // m) * m


def _make_fuse_kernel(n):
    def _fuse_kernel(*refs):
        # refs = (x_ref_0, ..., x_ref_{n-1}, o_ref); each block is (tile_r, 128).
        x_refs = refs[:n]
        o_ref = refs[n]
        acc = x_refs[0][...].astype(jnp.float32)
        for x_ref in x_refs[1:]:
            acc = acc + x_ref[...].astype(jnp.float32)
        o_ref[...] = acc.astype(o_ref.dtype)

    return _fuse_kernel


def latent_fusion(latents):
    """Sum a list of identically-shaped latent tensors elementwise."""
    n = len(latents)
    shape = latents[0].shape
    dtype = latents[0].dtype
    total = math.prod(shape)
    itemsize = jnp.dtype(dtype).itemsize
    # Sublane packing: 8 for 32-bit, 16 for 16-bit, 32 for 8-bit dtypes.
    sub = {4: 8, 2: 16, 1: 32}.get(itemsize, 8)

    rows = -(-total // _LANE)
    lane_padded_total = rows * _LANE
    needs_pad = lane_padded_total != total

    # ---- tile sizing --------------------------------------------------------
    row_bytes = _LANE * itemsize
    # Largest tile such that the whole double-buffered pipeline fits the budget.
    tile_cap = max(sub, (_VMEM_BUDGET // (2 * (n + 1) * row_bytes)) // sub * sub)
    # ~2 MiB per input block.
    tile_target = max(sub, _round_up(_TILE_TARGET_BYTES // row_bytes, sub))
    # Below this many rows per latent, launch overhead dominates: single block.
    min_split_rows = max(sub, _MIN_SPLIT_BYTES // row_bytes)

    if rows <= min(min_split_rows, tile_cap):
        # Single block covering the full array (block == array dims, so no
        # (8,128) divisibility requirement applies).
        tile_r = rows
    else:
        # At least 2 blocks (v7x megacore), capped by VMEM budget and target.
        half = _round_up(-(-rows // 2), sub)
        tile_r = max(sub, min(tile_target, tile_cap, half))

    grid = (-(-rows // tile_r),)

    # ---- input prep (no copies on the aligned path) -------------------------
    def prep(x):
        flat = x.reshape(-1)
        if needs_pad:
            # Only the ragged case (total % 128 != 0) pads, and only up to the
            # next lane multiple.
            flat = jnp.pad(flat, (0, lane_padded_total - total))
        return flat.reshape(rows, _LANE)

    xs = [prep(x) for x in latents]

    block = pl.BlockSpec((tile_r, _LANE), lambda i: (i, 0))
    cost = pl.CostEstimate(
        flops=max(n - 1, 0) * lane_padded_total,
        transcendentals=0,
        bytes_accessed=(n + 1) * lane_padded_total * itemsize,
    )

    out = pl.pallas_call(
        _make_fuse_kernel(n),
        out_shape=jax.ShapeDtypeStruct((rows, _LANE), dtype),
        grid=grid,
        in_specs=[pl.BlockSpec((tile_r, _LANE), lambda i: (i, 0)) for _ in range(n)],
        out_specs=block,
        compiler_params=pltpu.CompilerParams(
            dimension_semantics=("parallel",),
            vmem_limit_bytes=_VMEM_LIMIT,
        ),
        cost_estimate=cost,
    )(*xs)

    if needs_pad:
        return out.reshape(-1)[:total].reshape(shape)
    return out.reshape(shape)


if __name__ == "__main__":
    key = jax.random.PRNGKey(0)

    # 1) Primary (aligned, small) case: B*C*H*W = 2048 -> 16 rows of 128 lanes.
    B, C, H, W = 2, 4, 16, 16
    num_latents = 3
    keys = jax.random.split(key, num_latents)
    latents = [jax.random.normal(k, (B, C, H, W), dtype=jnp.float32) for k in keys]

    fused = jax.block_until_ready(latent_fusion(latents))
    ref = jnp.stack(latents, axis=0).sum(axis=0)
    assert fused.shape == (B, C, H, W)
    assert jnp.allclose(fused, ref, atol=1e-6, rtol=1e-6)

    # 2) Ragged case (total % 128 != 0): exercises the lane-pad / tail-slice path.
    keys2 = jax.random.split(jax.random.PRNGKey(1), 2)
    latents2 = [jax.random.normal(k, (2, 3, 5, 7), dtype=jnp.float32) for k in keys2]
    fused2 = jax.block_until_ready(latent_fusion(latents2))
    ref2 = jnp.stack(latents2, axis=0).sum(axis=0)
    assert fused2.shape == (2, 3, 5, 7)
    assert jnp.allclose(fused2, ref2, atol=1e-6, rtol=1e-6)

    # 3) Medium case: multi-block grid with a masked partial last block
    #    (rows = 1540, tile_r = 776 -> grid = 2, second block is partial).
    keys3 = jax.random.split(jax.random.PRNGKey(2), 4)
    latents3 = [jax.random.normal(k, (2, 7, 110, 128), dtype=jnp.float32) for k in keys3]
    fused3 = jax.block_until_ready(latent_fusion(latents3))
    ref3 = jnp.stack(latents3, axis=0).sum(axis=0)
    assert fused3.shape == (2, 7, 110, 128)
    assert jnp.allclose(fused3, ref3, atol=1e-5, rtol=1e-6)

    print("KERNEL_OK")
</pallas_src>

<mosaic_0001>
module attributes {stable_mosaic.version = 11 : i64} {
  func.func @_fuse_kernel(%arg0: i32, %arg1: memref<16x128xf32, #tpu.memory_space<vmem>>, %arg2: memref<16x128xf32, #tpu.memory_space<vmem>>, %arg3: memref<16x128xf32, #tpu.memory_space<vmem>>, %arg4: memref<16x128xf32, #tpu.memory_space<vmem>>) attributes {dimension_semantics = [#tpu.dimension_semantics<parallel>], iteration_bounds = array<i64: 1>, scalar_prefetch = 0 : i64, scratch_operands = 0 : i64, tpu.core_type = #tpu.core_type<tc>, window_params = [{transform_indices = @transform_0, window_bounds = array<i64: 16, 128>}, {transform_indices = @transform_1, window_bounds = array<i64: 16, 128>}, {transform_indices = @transform_2, window_bounds = array<i64: 16, 128>}, {transform_indices = @transform_3, window_bounds = array<i64: 16, 128>}]} {
    %c0 = arith.constant 0 : index
    %c0_0 = arith.constant 0 : index
    %0 = vector.load %arg1[%c0, %c0_0] : memref<16x128xf32, #tpu.memory_space<vmem>>, vector<16x128xf32>
    %c0_1 = arith.constant 0 : index
    %c0_2 = arith.constant 0 : index
    %1 = vector.load %arg2[%c0_1, %c0_2] : memref<16x128xf32, #tpu.memory_space<vmem>>, vector<16x128xf32>
    %2 = arith.addf %0, %1 : vector<16x128xf32>
    %c0_3 = arith.constant 0 : index
    %c0_4 = arith.constant 0 : index
    %3 = vector.load %arg3[%c0_3, %c0_4] : memref<16x128xf32, #tpu.memory_space<vmem>>, vector<16x128xf32>
    %4 = arith.addf %2, %3 : vector<16x128xf32>
    %c0_5 = arith.constant 0 : index
    %c0_6 = arith.constant 0 : index
    %5 = vector.load %arg4[%c0_5, %c0_6] : memref<16x128xf32, #tpu.memory_space<vmem>>, vector<16x128xf32>
    tpu.vector_store %arg4[%c0_5, %c0_6], %4 {strides = array<i32>} : memref<16x128xf32, #tpu.memory_space<vmem>>, vector<16x128xf32>,
    return
  }
  func.func @transform_0(%arg0: i32) -> (i32, i32) {
    %c0_i32 = arith.constant 0 : i32
    %c0_i32_0 = arith.constant 0 : i32
    return %arg0, %c0_i32 : i32, i32
  }
  func.func @transform_1(%arg0: i32) -> (i32, i32) {
    %c0_i32 = arith.constant 0 : i32
    %c0_i32_0 = arith.constant 0 : i32
    return %arg0, %c0_i32 : i32, i32
  }
  func.func @transform_2(%arg0: i32) -> (i32, i32) {
    %c0_i32 = arith.constant 0 : i32
    %c0_i32_0 = arith.constant 0 : i32
    return %arg0, %c0_i32 : i32, i32
  }
  func.func @transform_3(%arg0: i32) -> (i32, i32) {
    %c0_i32 = arith.constant 0 : i32
    %c0_i32_0 = arith.constant 0 : i32
    return %arg0, %c0_i32 : i32, i32
  }
}

</mosaic_0001>

<bundles_post_ra>
// kernel: tpu_custom_call.1
= control target key start
LH: loop header
LB: loop body
LE: loop exit
PB: predicated region body
PF: predicated region fallthrough
CT: control target
= control target key end

     0   :  { %8 = vsyncpa [#allocation3], 0  ;;  %s279_s0 = inlined_call_operand.hbm [shape: f32[16,128], index: 0, kind: input, shape index: {}]   ;;  %s280_s1 = inlined_call_operand.hbm [shape: f32[16,128], index: 1, kind: input, shape index: {}]   ;;  %s281_s2 = inlined_call_operand.hbm [shape: f32[16,128], index: 2, kind: input, shape index: {}]   ;;  %s282_s3 = inlined_call_operand.hbm [shape: f32[16,128], index: 3, kind: output, shape index: {}]  }
   0x1   :  { %9 = vsyncpa [#allocation6], 0 }
   0x2   :  { %10 = vsyncpa [#allocation4], 0  ;;  %s186_s12 = smov [#allocation5]   ;;  %s187_s14 = smov [#allocation2]  }
   0x3   :  { %s28_s13 = sshll.u32 %s186_s12, 4  ;;  %s16_s15 = sshll.u32 %s187_s14, 4  ;;  %s29_s13 = int_to_ptr.vmem [resolvable:$true] %s28_s13  ;;  %s212_s15 = int_to_ptr.vmem [resolvable:$true] %s16_s15 }
   0x4   :  { %s92_s18 = scalar_lea.hbm %s280_s1, 256 }
   0x5   :  { %p93_p0 = scmp.ne.s32.totalorder %s280_s1, %s92_s18  ;;  %p96_p1 = scmp.lt.u32.totalorder %s92_s18, %s280_s1 }
   0x7   :  { %p98_p2 = pnand %p96_p1, %p93_p0 }
   0x9   :  { %101 = shalt.err (!%p98_p2)
}
   0xa   :  { %s102_s23 = scalar_lea.vmem %s29_s13, 256  ;;  %p107_p4 = scmp.lt.s32.totalorder %s29_s13, %s29_s13 }
   0xb   :  { %p103_p3 = scmp.ne.s32.totalorder %s29_s13, %s102_s23  ;;  %p108_p5 = scmp.lt.s32.totalorder %s102_s23, %s102_s23 }
   0xd   :  { %p109_p6 = por %p108_p5, %p107_p4 }
   0xf   :  { %p110_p7 = pnand %p109_p6, %p103_p3 }
  0x11   :  { %113 = shalt.err (!%p110_p7)
}
  0x12   :  { %s188_s24 = smov 128   ;;  %s189_s25 = smov 8  }
  0x13   :  { %34 = dma.hbm_to_vmem [thread:$0]  %s280_s1, 256, %s29_s13, [#allocation6], %s188_s24, %s188_s24, %s189_s25  }
  0x14   :  { %s114_s30 = scalar_lea.hbm %s279_s0, 256 }
  0x15   :  { %p115_p8 = scmp.ne.s32.totalorder %s279_s0, %s114_s30  ;;  %p118_p9 = scmp.lt.u32.totalorder %s114_s30, %s279_s0 }
  0x17   :  { %p120_p10 = pnand %p118_p9, %p115_p8 }
  0x19   :  { %123 = shalt.err (!%p120_p10)
}
  0x1a   :  { %s124_s8 = scalar_lea.vmem %s212_s15, 256  ;;  %p129_p12 = scmp.lt.s32.totalorder %s212_s15, %s212_s15 }
  0x1b   :  { %p125_p11 = scmp.ne.s32.totalorder %s212_s15, %s124_s8  ;;  %p130_p13 = scmp.lt.s32.totalorder %s124_s8, %s124_s8 }
  0x1d   :  { %p131_p0 = por %p130_p13, %p129_p12 }
  0x1f   :  { %p132_p1 = pnand %p131_p0, %p125_p11 }
  0x21   :  { %135 = shalt.err (!%p132_p1)
}
  0x22   :  { %22 = dma.hbm_to_vmem [thread:$0]  %s279_s0, 256, %s212_s15, [#allocation3], %s188_s24, %s188_s24, %s189_s25  }
  0x23   :  { %s190_s10 = smov [#allocation7]   ;;  %s136_s14 = scalar_lea.hbm %s281_s2, 256 }
  0x24   :  { %s40_s11 = sshll.u32 %s190_s10, 4  ;;  %p137_p2 = scmp.ne.s32.totalorder %s281_s2, %s136_s14  ;;  %s41_s11 = int_to_ptr.vmem [resolvable:$true] %s40_s11 }
  0x25   :  { %p140_p3 = scmp.lt.u32.totalorder %s136_s14, %s281_s2 }
  0x27   :  { %p142_p4 = pnand %p140_p3, %p137_p2 }
  0x29   :  { %145 = shalt.err (!%p142_p4)
}
  0x2a   :  { %s146_s20 = scalar_lea.vmem %s41_s11, 256  ;;  %p151_p6 = scmp.lt.s32.totalorder %s41_s11, %s41_s11 }
  0x2b   :  { %p147_p5 = scmp.ne.s32.totalorder %s41_s11, %s146_s20  ;;  %p152_p7 = scmp.lt.s32.totalorder %s146_s20, %s146_s20 }
  0x2d   :  { %p153_p8 = por %p152_p7, %p151_p6 }
  0x2f   :  { %p154_p9 = pnand %p153_p8, %p147_p5 }
  0x31   :  { %157 = shalt.err (!%p154_p9)
}
  0x32   :  { %46 = dma.hbm_to_vmem [thread:$0]  %s281_s2, 256, %s41_s11, [#allocation6], %s188_s24, %s188_s24, %s189_s25  }
  0x33   :  { %180 = dma.done.wait [#allocation3], 256  }
  0x34   :  { %181 = vsyncadd [#allocation3], 4294967040 }
  0x35   :  { %182 = dma.done.wait [#allocation6], 512  }
  0x36   :  { %183 = vsyncadd [#allocation6], 4294966784  ;;  %v56_v0 = vld [vmem:[#allocation2] sm:$0xff]  ;;  %v58_v1 = vld [vmem:[#allocation5] sm:$0xff]  ;;  %s191_s21 = smov [#allocation8]  }
  0x37   :  { %v62_v2 = vld [vmem:[#allocation7] sm:$0xff]  ;;  %v60_v3 = vadd.f32 %v58_v1, %v56_v0  ;;  %v57_v4 = vld [vmem:[#allocation2 + $0x8] sm:$0xff]  ;;  %v59_v5 = vld [vmem:[#allocation5 + $0x8] sm:$0xff]  ;;  %s73_s22 = sshll.u32 %s191_s21, 4  ;;  %s74_s22 = int_to_ptr.vmem [resolvable:$true] %s73_s22 }
  0x38   :  { %v63_v6 = vld [vmem:[#allocation7 + $0x8] sm:$0xff]  ;;  %v61_v7 = vadd.f32 %v59_v5, %v57_v4  ;;  %s158_s2 = scalar_lea.vmem %s74_s22, 256  ;;  %p163_p11 = scmp.lt.s32.totalorder %s74_s22, %s74_s22 }
  0x39   :  { %v64_v8 = vadd.f32 %v62_v2, %v60_v3  ;;  %p159_p10 = scmp.ne.s32.totalorder %s74_s22, %s158_s2  ;;  %p164_p12 = scmp.lt.s32.totalorder %s158_s2, %s158_s2 }
  0x3a   :  { %v65_v9 = vadd.f32 %v63_v6, %v61_v7 }
  0x3b   :  { %66 = vst [vmem:[#allocation8] sm:$0xff] %v64_v8  ;;  %p165_p13 = por %p164_p12, %p163_p11 }
  0x3c   :  { %67 = vst [vmem:[#allocation8 + $0x8] sm:$0xff] %v65_v9 }
  0x3d   :  { %p166_p0 = pnand %p165_p13, %p159_p10 }
  0x3f   :  { %169 = shalt.err (!%p166_p0)
}
  0x40   :  { %s170_s27 = scalar_lea.hbm %s282_s3, 256 }
  0x41   :  { %p171_p1 = scmp.ne.s32.totalorder %s282_s3, %s170_s27  ;;  %p174_p2 = scmp.lt.u32.totalorder %s170_s27, %s282_s3 }
  0x43   :  { %p176_p3 = pnand %p174_p2, %p171_p1 }
  0x45   :  { %179 = shalt.err (!%p176_p3)
}
  0x46   :  { %79 = dma.vmem_to_hbm [thread:$0]  %s74_s22, 256, %s282_s3, [#allocation4], %s188_s24, %s188_s24, %s189_s25  }
  0x47   :  { %184 = dma.done.wait [#allocation4], 256  }
  0x48   :  { %185 = vsyncadd [#allocation4], 4294967040 }
  0x49   :  { %83 = vsyncpa [#allocation3], 1 }
  0x4a   :  { %84 = vsyncpa [#allocation6], 1 }
  0x4b   :  { %85 = vsyncpa [#allocation4], 1 }

</bundles_post_ra>
